<compile_context>
chip_gen: v5e
topology: v5e:2x2
jax: 0.10.0
libtpu: 0.0.40
codegen_flags: <defaults>
</compile_context>

<pallas_src>
import jax
import jax.numpy as jnp
from jax import lax
from jax.experimental import pallas as pl
from jax.experimental.pallas import tpu as pltpu

IN_FEATURES = 64
OUT_FEATURES = 64
_FOLD = 2                      # rows folded into one 128-lane row
_TB_MAX = 4096                 # max folded rows per grid step (2 MiB/buffer f32)


def _linear_kernel(x_ref, w_ref, b_ref, o_ref):
    # x_ref: (tb, 128)  folded-activation tile (two logical rows per row)
    # w_ref: (128, 128) block-diagonal folded weight (K_fold x N_fold)
    # b_ref: (1, 128)   folded bias
    acc = jnp.dot(
        x_ref[...],
        w_ref[...],
        preferred_element_type=jnp.float32,
        precision=lax.Precision.HIGHEST,
    )
    o_ref[...] = (acc + b_ref[...]).astype(o_ref.dtype)


def _pick_tile(rows_padded: int) -> int:
    """Folded-row tile: big enough to amortize per-step overhead, but >=2 grid
    steps whenever there is enough work (keeps both v7x TensorCores busy)."""
    if rows_padded < 16:
        return rows_padded
    half = -(-rows_padded // 2)            # cdiv(rows, 2)
    half = ((half + 7) // 8) * 8           # round up to sublane multiple
    return min(_TB_MAX, half)


def fc_forward(x, weight, bias):
    """x: (B, 64) f32; weight: (64, 64) PyTorch (out, in) layout; bias: (64,)."""
    B, K = x.shape
    N = weight.shape[0]
    KF, NF = _FOLD * K, _FOLD * N          # 128, 128

    # ---- 2-way lane-dense fold (wrapper-side, free reshapes) -------------
    rows = -(-B // _FOLD)                  # folded rows needed
    rows_padded = max(8, ((rows + 7) // 8) * 8)
    pad_b = rows_padded * _FOLD - B
    x_p = jnp.pad(x, ((0, pad_b), (0, 0))) if pad_b else x
    x2 = x_p.reshape(rows_padded, KF)      # (B'/2, 128) — no data movement

    wt = weight.T                          # (K, N)
    zeros = jnp.zeros((K, N), dtype=weight.dtype)
    w2 = jnp.block([[wt, zeros], [zeros, wt]])          # (128, 128) block-diag
    b2 = jnp.concatenate([bias, bias]).reshape(1, NF)   # (1, 128)

    # ---- grid / tiling ----------------------------------------------------
    tb = _pick_tile(rows_padded)
    grid = (pl.cdiv(rows_padded, tb),)

    bytes_accessed = 4 * (x2.size + w2.size + b2.size + rows_padded * NF)
    cost = pl.CostEstimate(
        flops=2 * B * K * N, transcendentals=0, bytes_accessed=bytes_accessed
    )

    y2 = pl.pallas_call(
        _linear_kernel,
        out_shape=jax.ShapeDtypeStruct((rows_padded, NF), x.dtype),
        grid=grid,
        in_specs=[
            pl.BlockSpec((tb, KF), lambda i: (i, 0)),    # stream folded x
            pl.BlockSpec((KF, NF), lambda i: (0, 0)),    # weight VMEM-resident
            pl.BlockSpec((1, NF), lambda i: (0, 0)),     # bias VMEM-resident
        ],
        out_specs=pl.BlockSpec((tb, NF), lambda i: (i, 0)),
        compiler_params=pltpu.CompilerParams(
            dimension_semantics=("parallel",),           # megacore on v7x
            vmem_limit_bytes=32 * 1024 * 1024,           # headroom on all gens
        ),
        cost_estimate=cost,
    )(x2, w2, b2)

    # ---- un-fold and drop pad rows ----------------------------------------
    y = y2.reshape(rows_padded * _FOLD, N)
    return y[:B] if pad_b else y


def fc_reference(x, weight, bias):
    return x @ weight.T + bias


def _check(B, kx, kw, kb):
    x = jax.random.normal(kx, (B, IN_FEATURES), dtype=jnp.float32)
    # Deterministic init mimicking nn.Linear's uniform(-1/sqrt(in), 1/sqrt(in))
    bound = 1.0 / jnp.sqrt(jnp.float32(IN_FEATURES))
    weight = jax.random.uniform(kw, (OUT_FEATURES, IN_FEATURES),
                                dtype=jnp.float32, minval=-bound, maxval=bound)
    bias = jax.random.uniform(kb, (OUT_FEATURES,), dtype=jnp.float32,
                              minval=-bound, maxval=bound)

    y = fc_forward(x, weight, bias)
    y = jax.block_until_ready(y)

    y_ref = fc_reference(x, weight, bias)
    assert y.shape == (B, OUT_FEATURES)
    assert jnp.allclose(y, y_ref, atol=1e-5, rtol=1e-5), f"mismatch at B={B}"


if __name__ == "__main__":
    key = jax.random.PRNGKey(0)
    kx, kw, kb = jax.random.split(key, 3)

    # Small shape consistent with the module (single grid step, padded fold).
    _check(8, kx, kw, kb)
    # Odd batch: exercises the fold's pad-and-drop path.
    _check(33, kx, kw, kb)
    # Larger batch: multi-step grid with a partial last tile.
    _check(1536, kx, kw, kb)

    print("KERNEL_OK")
</pallas_src>

<mosaic_0001>
module attributes {stable_mosaic.version = 11 : i64} {
  func.func @_linear_kernel(%arg0: i32, %arg1: memref<8x128xf32, #tpu.memory_space<vmem>>, %arg2: memref<128x128xf32, #tpu.memory_space<vmem>>, %arg3: memref<1x128xf32, #tpu.memory_space<vmem>>, %arg4: memref<8x128xf32, #tpu.memory_space<vmem>>) attributes {dimension_semantics = [#tpu.dimension_semantics<parallel>], iteration_bounds = array<i64: 1>, scalar_prefetch = 0 : i64, scratch_operands = 0 : i64, tpu.core_type = #tpu.core_type<tc>, window_params = [{transform_indices = @transform_0, window_bounds = array<i64: 8, 128>}, {pipeline_mode = #tpu.pipeline_mode<synchronous>, transform_indices = @transform_1, window_bounds = array<i64: 128, 128>}, {pipeline_mode = #tpu.pipeline_mode<synchronous>, transform_indices = @transform_2, window_bounds = array<i64: 1, 128>}, {transform_indices = @transform_3, window_bounds = array<i64: 8, 128>}]} {
    %c0 = arith.constant 0 : index
    %c0_0 = arith.constant 0 : index
    %0 = vector.load %arg1[%c0, %c0_0] : memref<8x128xf32, #tpu.memory_space<vmem>>, vector<8x128xf32>
    %c0_1 = arith.constant 0 : index
    %c0_2 = arith.constant 0 : index
    %1 = vector.load %arg2[%c0_1, %c0_2] : memref<128x128xf32, #tpu.memory_space<vmem>>, vector<128x128xf32>
    %cst = arith.constant dense<0.000000e+00> : vector<8x128xf32>
    %2 = tpu.matmul %0, %1, %cst {dimension_numbers = #tpu.dot_dimension_numbers<[1], [0], [0], [1], [0, 0, 1, 1], [], []>, precision = #tpu.contract_precision<fp32>} : vector<8x128xf32>, vector<128x128xf32>, vector<8x128xf32> -> vector<8x128xf32>
    %c0_3 = arith.constant 0 : index
    %c0_4 = arith.constant 0 : index
    %3 = vector.load %arg3[%c0_3, %c0_4] : memref<1x128xf32, #tpu.memory_space<vmem>>, vector<1x128xf32>
    %4 = vector.broadcast %3 : vector<1x128xf32> to vector<8x128xf32>
    %5 = arith.addf %2, %4 : vector<8x128xf32>
    %c0_5 = arith.constant 0 : index
    %c0_6 = arith.constant 0 : index
    %6 = vector.load %arg4[%c0_5, %c0_6] : memref<8x128xf32, #tpu.memory_space<vmem>>, vector<8x128xf32>
    tpu.vector_store %arg4[%c0_5, %c0_6], %5 {strides = array<i32>} : memref<8x128xf32, #tpu.memory_space<vmem>>, vector<8x128xf32>,
    return
  }
  func.func @transform_0(%arg0: i32) -> (i32, i32) {
    %c0_i32 = arith.constant 0 : i32
    %c0_i32_0 = arith.constant 0 : i32
    return %arg0, %c0_i32 : i32, i32
  }
  func.func @transform_1(%arg0: i32) -> (i32, i32) {
    %c0_i32 = arith.constant 0 : i32
    %c0_i32_0 = arith.constant 0 : i32
    %c0_i32_1 = arith.constant 0 : i32
    return %c0_i32, %c0_i32_0 : i32, i32
  }
  func.func @transform_2(%arg0: i32) -> (i32, i32) {
    %c0_i32 = arith.constant 0 : i32
    %c0_i32_0 = arith.constant 0 : i32
    %c0_i32_1 = arith.constant 0 : i32
    return %c0_i32, %c0_i32_0 : i32, i32
  }
  func.func @transform_3(%arg0: i32) -> (i32, i32) {
    %c0_i32 = arith.constant 0 : i32
    %c0_i32_0 = arith.constant 0 : i32
    return %arg0, %c0_i32 : i32, i32
  }
}

</mosaic_0001>

<bundles_post_ra>
// kernel: tpu_custom_call.1
= control target key start
LH: loop header
LB: loop body
LE: loop exit
PB: predicated region body
PF: predicated region fallthrough
CT: control target
= control target key end

     0   :  { %8 = vsyncpa [#allocation3], 0  ;;  %s785_s0 = inlined_call_operand.hbm [shape: f32[8,128], index: 0, kind: input, shape index: {}]   ;;  %s786_s1 = inlined_call_operand.hbm [shape: f32[128,128], index: 1, kind: input, shape index: {}]   ;;  %s787_s2 = inlined_call_operand.vmem [shape: f32[1,128], index: 2, kind: input, shape index: {}]   ;;  %s788_s3 = inlined_call_operand.hbm [shape: f32[8,128], index: 3, kind: output, shape index: {}]  }
   0x1   :  { %9 = vsyncpa [#allocation6], 0 }
   0x2   :  { %10 = vsyncpa [#allocation4], 0  ;;  %s16_s14 = sshll.u32 %s785_s0, 4  ;;  %s510_s15 = smov [#allocation2]   ;;  %s17_s14 = int_to_ptr.hbm [resolvable:$true] %s16_s14 }
   0x3   :  { %s18_s16 = sshll.u32 %s510_s15, 4  ;;  %s26_s19 = sshll.u32 %s786_s1, 4  ;;  %s19_s16 = int_to_ptr.vmem [resolvable:$true] %s18_s16  ;;  %s27_s19 = int_to_ptr.hbm [resolvable:$true] %s26_s19 }
   0x4   :  { %21 = dma.hbm_to_vmem [thread:$0]  %s17_s14, 128, %s19_s16, [#allocation3]  }
   0x5   :  { %s511_s20 = smov [#allocation5]   ;;  %s512_s22 = smov 128  }
   0x6   :  { %s28_s21 = sshll.u32 %s511_s20, 4  ;;  %s513_s23 = smov 8   ;;  %s29_s21 = int_to_ptr.vmem [resolvable:$true] %s28_s21 }
   0x7   :  { %34 = dma.hbm_to_vmem [thread:$0]  %s27_s19, 2048, %s29_s21, [#allocation6], %s512_s22, %s512_s22, %s513_s23  }
   0x8   :  { %504 = dma.done.wait [#allocation3], 128  }
   0x9   :  { %505 = vsyncadd [#allocation3], 4294967168 }
   0xa   :  { %506 = dma.done.wait [#allocation6], 2048  }
   0xb   :  { %507 = vsyncadd [#allocation6], 4294965248  ;;  %v61_v0 = vld [vmem:[#allocation5 + $0x78] sm:$0xff]  ;;  %v60_v1 = vld [vmem:[#allocation5 + $0x70] sm:$0xff]  ;;  %s514_s24 = smov [#allocation7]   ;;  %s415_s28 = sshll.u32 %s788_s3, 4  ;;  %s416_s28 = int_to_ptr.hbm [resolvable:$true] %s415_s28 }
   0xc   :  { %v59_v2 = vld [vmem:[#allocation5 + $0x68] sm:$0xff]  ;;  %v541_v3 = vand.u32 4294901760, %v61_v0  ;;  %v543_v4 = vand.u32 4294901760, %v60_v1  ;;  %v58_v6 = vld [vmem:[#allocation5 + $0x60] sm:$0xff]  ;;  %v57_v7 = vld [vmem:[#allocation5 + $0x58] sm:$0xff]  ;;  %s413_s25 = sshll.u32 %s514_s24, 4  ;;  %s414_s25 = int_to_ptr.vmem [resolvable:$true] %s413_s25 }
   0xd   :  { %v545_v5 = vand.u32 4294901760, %v59_v2  ;;  %v56_v8 = vld [vmem:[#allocation5 + $0x50] sm:$0xff]  ;;  %v547_v9 = vand.u32 4294901760, %v58_v6  ;;  %v549_v10 = vand.u32 4294901760, %v57_v7  ;;  %v55_v12 = vld [vmem:[#allocation5 + $0x48] sm:$0xff]  ;;  %v54_v13 = vld [vmem:[#allocation5 + $0x40] sm:$0xff] }
   0xe   :  { %v551_v11 = vand.u32 4294901760, %v56_v8  ;;  %67 = vmatpush.msra.mxu0 %v541_v3  ;;  %v555_v14 = vsub.f32 %v61_v0, %v541_v3  ;;  %v558_v15 = vsub.f32 %v60_v1, %v543_v4  ;;  %v563_v17 = vand.u32 4294901760, %v55_v12  ;;  %263 = vmatpush.msra.mxu3 %v541_v3  ;;  %v53_v21 = vld [vmem:[#allocation5 + $0x38] sm:$0xff]  ;;  %v52_v34 = vld [vmem:[#allocation5 + $0x30] sm:$0xff]  ;;  %v51_v35 = vld [vmem:[#allocation5 + $0x28] sm:$0xff] }
   0xf   :  { %v561_v16 = vsub.f32 %v59_v2, %v545_v5  ;;  %v567_v18 = vsub.f32 %v58_v6, %v547_v9  ;;  %v570_v19 = vsub.f32 %v57_v7, %v549_v10  ;;  %v572_v20 = vand.u32 4294901760, %v54_v13  ;;  %v50_v42 = vld [vmem:[#allocation5 + $0x20] sm:$0xff]  ;;  %v49_v47 = vld [vmem:[#allocation5 + $0x18] sm:$0xff]  ;;  %v48_v53 = vld [vmem:[#allocation5 + $0x10] sm:$0xff] }
  0x10   :  { %69 = vmatpush.msra.mxu0 %v543_v4  ;;  %v109_v22 = vand.u32 4294901760, %v555_v14  ;;  %v115_v23 = vand.u32 4294901760, %v558_v15  ;;  %v579_v25 = vsub.f32 %v56_v8, %v551_v11  ;;  %210 = vmatpush.msra.mxu2 %v555_v14  ;;  %v585_v28 = vsub.f32 %v55_v12, %v563_v17  ;;  %v47_v61 = vld [vmem:[#allocation5 + $0x8] sm:$0xff]  ;;  %v46_v2 = vld [vmem:[#allocation5] sm:$0xff] }
  0x11   :  { %v121_v24 = vand.u32 4294901760, %v561_v16  ;;  %v127_v26 = vand.u32 4294901760, %v567_v18  ;;  %v133_v27 = vand.u32 4294901760, %v570_v19  ;;  %265 = vmatpush.msra.mxu3 %v543_v4  ;;  %v598_v32 = vand.u32 4294901760, %v53_v21 }
  0x12   :  { %v110_v29 = vsub.f32 %v555_v14, %v109_v22  ;;  %71 = vmatpush.msra.mxu0 %v545_v5  ;;  %v116_v30 = vsub.f32 %v558_v15, %v115_v23  ;;  %213 = vmatpush.msra.mxu2 %v558_v15  ;;  %v602_v33 = vsub.f32 %v54_v13, %v572_v20  ;;  %v139_v39 = vand.u32 4294901760, %v579_v25 }
  0x13   :  { %v122_v31 = vsub.f32 %v561_v16, %v121_v24  ;;  %267 = vmatpush.msra.mxu3 %v545_v5  ;;  %v128_v38 = vsub.f32 %v567_v18, %v127_v26  ;;  %v134_v40 = vsub.f32 %v570_v19, %v133_v27  ;;  %v145_v41 = vand.u32 4294901760, %v585_v28 }
  0x14   :  { %v111_v36 = vand.u32 4294901760, %v110_v29  ;;  %v117_v37 = vand.u32 4294901760, %v116_v30  ;;  %73 = vmatpush.msra.mxu0 %v547_v9  ;;  %216 = vmatpush.msra.mxu2 %v561_v16  ;;  %v617_v44 = vand.u32 4294901760, %v52_v34  ;;  %v620_v45 = vsub.f32 %v53_v21, %v598_v32  ;;  %v45_v29 = vld [vmem:[#allocation2] sm:$0xff] }
  0x15   :  { %269 = vmatpush.msra.mxu3 %v547_v9  ;;  %v123_v43 = vand.u32 4294901760, %v122_v31  ;;  %v622_v46 = vand.u32 4294901760, %v51_v35  ;;  %v151_v48 = vand.u32 4294901760, %v602_v33  ;;  %v129_v49 = vand.u32 4294901760, %v128_v38 }
  0x16   :  { %112 = vmatpush.msra.mxu1 %v111_v36  ;;  %75 = vmatpush.msra.mxu0 %v549_v10  ;;  %v140_v50 = vsub.f32 %v579_v25, %v139_v39  ;;  %v632_v51 = vsub.f32 %v52_v34, %v617_v44  ;;  %v634_v52 = vand.u32 4294901760, %v50_v42  ;;  %v636_v54 = vand.u32 4294901760, %v49_v47 }
  0x17   :  { %219 = vmatpush.msra.mxu2 %v567_v18  ;;  %271 = vmatpush.msra.mxu3 %v549_v10  ;;  %v135_v55 = vand.u32 4294901760, %v134_v40  ;;  %v146_v56 = vsub.f32 %v585_v28, %v145_v41  ;;  %v157_v57 = vand.u32 4294901760, %v620_v45  ;;  %v646_v58 = vsub.f32 %v51_v35, %v622_v46 }
  0x18   :  { %118 = vmatpush.msra.mxu1 %v117_v37  ;;  %77 = vmatpush.msra.mxu0 %v551_v11  ;;  %v152_v59 = vsub.f32 %v602_v33, %v151_v48  ;;  %v651_v60 = vand.u32 4294901760, %v48_v53  ;;  %v141_v62 = vand.u32 4294901760, %v140_v50  ;;  %v163_v63 = vand.u32 4294901760, %v632_v51 }
  0x19   :  { %222 = vmatpush.msra.mxu2 %v570_v19  ;;  %273 = vmatpush.msra.mxu3 %v551_v11  ;;  %v658_v0 = vsub.f32 %v50_v42, %v634_v52  ;;  %v661_v1 = vsub.f32 %v49_v47, %v636_v54  ;;  %v147_v6 = vand.u32 4294901760, %v146_v56  ;;  %v158_v7 = vsub.f32 %v620_v45, %v157_v57 }
  0x1a   :  { %124 = vmatpush.msra.mxu1 %v123_v43  ;;  %79 = vmatpush.msra.mxu0 %v563_v17  ;;  %v169_v8 = vand.u32 4294901760, %v646_v58  ;;  %v670_v12 = vand.u32 4294901760, %v47_v61  ;;  %v153_v13 = vand.u32 4294901760, %v152_v59  ;;  %v673_v21 = vsub.f32 %v48_v53, %v651_v60 }
  0x1b   :  { %225 = vmatpush.msra.mxu2 %v579_v25  ;;  %275 = vmatpush.msra.mxu3 %v563_v17  ;;  %v164_v30 = vsub.f32 %v632_v51, %v163_v63  ;;  %v175_v31 = vand.u32 4294901760, %v658_v0  ;;  %v682_v34 = vand.u32 4294901760, %v46_v2  ;;  %v684_v35 = vand.u32 4294901760, %v45_v29 }
  0x1c   :  { %130 = vmatpush.msra.mxu1 %v129_v49  ;;  %81 = vmatpush.msra.mxu0 %v572_v20  ;;  %v181_v36 = vand.u32 4294901760, %v661_v1  ;;  %v159_v37 = vand.u32 4294901760, %v158_v7  ;;  %v170_v38 = vsub.f32 %v646_v58, %v169_v8  ;;  %v694_v40 = vsub.f32 %v47_v61, %v670_v12 }
  0x1d   :  { %228 = vmatpush.msra.mxu2 %v585_v28  ;;  %277 = vmatpush.msra.mxu3 %v572_v20  ;;  %v99_v42 = vsub.f32 %v45_v29, %v684_v35  ;;  %v165_v43 = vand.u32 4294901760, %v164_v30  ;;  %v176_v47 = vsub.f32 %v658_v0, %v175_v31  ;;  %v187_v49 = vand.u32 4294901760, %v673_v21 }
  0x1e   :  { %136 = vmatpush.msra.mxu1 %v135_v55  ;;  %83 = vmatpush.msra.mxu0 %v598_v32  ;;  %v705_v50 = vsub.f32 %v46_v2, %v682_v34  ;;  %v171_v53 = vand.u32 4294901760, %v170_v38  ;;  %v182_v55 = vsub.f32 %v661_v1, %v181_v36  ;;  %v193_v56 = vand.u32 4294901760, %v694_v40 }
  0x1f   :  { %231 = vmatpush.msra.mxu2 %v602_v33  ;;  %279 = vmatpush.msra.mxu3 %v598_v32  ;;  %v100_v59 = vand.u32 4294901760, %v99_v42  ;;  %v177_v61 = vand.u32 4294901760, %v176_v47 }
  0x20   :  { %142 = vmatpush.msra.mxu1 %v141_v62  ;;  %85 = vmatpush.msra.mxu0 %v617_v44  ;;  %v188_v62 = vsub.f32 %v673_v21, %v187_v49  ;;  %v199_v2 = vand.u32 4294901760, %v705_v50  ;;  %v194_v7 = vsub.f32 %v694_v40, %v193_v56 }
  0x21   :  { %234 = vmatpush.msra.mxu2 %v620_v45  ;;  %281 = vmatpush.msra.mxu3 %v617_v44 }
  0x22   :  { %148 = vmatpush.msra.mxu1 %v147_v6  ;;  %87 = vmatpush.msra.mxu0 %v622_v46  ;;  %v183_v6 = vand.u32 4294901760, %v182_v55  ;;  %v189_v29 = vand.u32 4294901760, %v188_v62  ;;  %v200_v30 = vsub.f32 %v705_v50, %v199_v2 }
  0x23   :  { %237 = vmatpush.msra.mxu2 %v632_v51  ;;  %283 = vmatpush.msra.mxu3 %v622_v46 }
  0x24   :  { %154 = vmatpush.msra.mxu1 %v153_v13  ;;  %89 = vmatpush.msra.mxu0 %v634_v52  ;;  %v101_v13 = vsub.f32 %v99_v42, %v100_v59 }
  0x25   :  { %240 = vmatpush.msra.mxu2 %v646_v58  ;;  %285 = vmatpush.msra.mxu3 %v634_v52 }
  0x26   :  { %160 = vmatpush.msra.mxu1 %v159_v37  ;;  %91 = vmatpush.msra.mxu0 %v636_v54  ;;  %v195_v37 = vand.u32 4294901760, %v194_v7  ;;  %v102_v38 = vand.u32 4294901760, %v101_v13 }
  0x27   :  { %243 = vmatpush.msra.mxu2 %v658_v0  ;;  %287 = vmatpush.msra.mxu3 %v636_v54 }
  0x28   :  { %166 = vmatpush.msra.mxu1 %v165_v43  ;;  %93 = vmatpush.msra.mxu0 %v651_v60  ;;  %v201_v43 = vand.u32 4294901760, %v200_v30 }
  0x29   :  { %246 = vmatpush.msra.mxu2 %v661_v1  ;;  %289 = vmatpush.msra.mxu3 %v651_v60 }
  0x2a   :  { %172 = vmatpush.msra.mxu1 %v171_v53  ;;  %95 = vmatpush.msra.mxu0 %v670_v12 }
  0x2b   :  { %249 = vmatpush.msra.mxu2 %v673_v21  ;;  %291 = vmatpush.msra.mxu3 %v670_v12 }
  0x2c   :  { %178 = vmatpush.msra.mxu1 %v177_v61  ;;  %97 = vmatpush.msra.mxu0 %v682_v34 }
  0x2d   :  { %252 = vmatpush.msra.mxu2 %v694_v40  ;;  %293 = vmatpush.msra.mxu3 %v682_v34 }
  0x2e   :  { %304 = vmatpush.msrb.mxu0 %v109_v22  ;;  %184 = vmatpush.msra.mxu1 %v183_v6 }
  0x2f   :  { %255 = vmatpush.msra.mxu2 %v705_v50  ;;  %297 = vmatmul.f32.vlgmr.msra.gmra.mxu3 %v100_v59 }
  0x30   :  { %308 = vmatpush.msrb.mxu0 %v115_v23  ;;  %190 = vmatpush.msra.mxu1 %v189_v29 }
  0x31   :  { %258 = vmatmul.f32.vlgmr.msra.gmra.mxu2 %v99_v42  ;;  %103 = vmatmul.f32.vlgmr.msra.gmra.mxu0 %v102_v38 }
  0x32   :  { %312 = vmatpush.msrb.mxu0 %v121_v24  ;;  %196 = vmatpush.msra.mxu1 %v195_v37 }
  0x34   :  { %316 = vmatpush.msrb.mxu0 %v127_v26  ;;  %202 = vmatpush.msra.mxu1 %v201_v43 }
  0x35   :  { %204 = vmatmul.f32.vlgmr.msra.gmra.mxu1 %v684_v35 }
  0x36   :  { %371 = vmatpush.msrb.mxu1 %v541_v3  ;;  %320 = vmatpush.msrb.mxu0 %v133_v27  ;;  %v431_v3 = vld [vmem:[%s787_s2] ss:$0 sm:$0xff] }
  0x38   :  { %373 = vmatpush.msrb.mxu1 %v543_v4  ;;  %324 = vmatpush.msrb.mxu0 %v139_v39 }
  0x3a   :  { %375 = vmatpush.msrb.mxu1 %v545_v5  ;;  %328 = vmatpush.msrb.mxu0 %v145_v41 }
  0x3c   :  { %377 = vmatpush.msrb.mxu1 %v547_v9  ;;  %332 = vmatpush.msrb.mxu0 %v151_v48 }
  0x3e   :  { %379 = vmatpush.msrb.mxu1 %v549_v10  ;;  %336 = vmatpush.msrb.mxu0 %v157_v57 }
  0x40   :  { %381 = vmatpush.msrb.mxu1 %v551_v11  ;;  %340 = vmatpush.msrb.mxu0 %v163_v63 }
  0x42   :  { %383 = vmatpush.msrb.mxu1 %v563_v17  ;;  %344 = vmatpush.msrb.mxu0 %v169_v8 }
  0x44   :  { %385 = vmatpush.msrb.mxu1 %v572_v20  ;;  %348 = vmatpush.msrb.mxu0 %v175_v31 }
  0x46   :  { %387 = vmatpush.msrb.mxu1 %v598_v32  ;;  %352 = vmatpush.msrb.mxu0 %v181_v36 }
  0x48   :  { %389 = vmatpush.msrb.mxu1 %v617_v44  ;;  %356 = vmatpush.msrb.mxu0 %v187_v49 }
  0x4a   :  { %391 = vmatpush.msrb.mxu1 %v622_v46  ;;  %360 = vmatpush.msrb.mxu0 %v193_v56 }
  0x4c   :  { %393 = vmatpush.msrb.mxu1 %v634_v52  ;;  %364 = vmatpush.msrb.mxu0 %v199_v2 }
  0x4d   :  { %366 = vmatmul.f32.vlgmr.msrb.gmra.mxu0 %v684_v35 }
  0x4e   :  { %395 = vmatpush.msrb.mxu1 %v636_v54 }
  0x50   :  { %397 = vmatpush.msrb.mxu1 %v651_v60 }
  0x52   :  { %399 = vmatpush.msrb.mxu1 %v670_v12 }
  0x54   :  { %401 = vmatpush.msrb.mxu1 %v682_v34 }
  0x55   :  { %403 = vmatmul.f32.vlgmr.msrb.gmra.mxu1 %v684_v35 }
  0xae   :  { %v104_v4 = vpop.f32.mrf.mxu0 }
  0xaf   :  { %v105_v5 = vadd.f32 %v431_v3, %v104_v4 }
  0xb2   :  { %v205_v9 = vpop.f32.mrf.mxu1  ;;  %v298_v15 = vpop.f32.mrf.mxu3 }
  0xb3   :  { %v206_v10 = vadd.f32 %v205_v9, %v105_v5 }
  0xb4   :  { %v259_v11 = vpop.f32.mrf.mxu2 }
  0xb5   :  { %v260_v14 = vadd.f32 %v259_v11, %v206_v10 }
  0xb7   :  { %v299_v16 = vadd.f32 %v298_v15, %v260_v14 }
  0xca   :  { %v367_v17 = vpop.f32.mrf.mxu0 }
  0xcb   :  { %v368_v18 = vadd.f32 %v367_v17, %v299_v16 }
  0xd2   :  { %v404_v19 = vpop.f32.mrf.mxu1 }
  0xd3   :  { %v405_v20 = vadd.f32 %v404_v19, %v368_v18 }
  0xd5   :  { %407 = vst [vmem:[#allocation7] sm:$0xff] %v405_v20 }
  0xd6   :  { %418 = dma.vmem_to_hbm [thread:$0]  %s414_s25, 128, %s416_s28, [#allocation4]  }
  0xd7   :  { %508 = dma.done.wait [#allocation4], 128  }
  0xd8   :  { %509 = vsyncadd [#allocation4], 4294967168 }
  0xd9   :  { %423 = vsyncpa [#allocation3], 1 }
  0xda   :  { %424 = vsyncpa [#allocation6], 1 }
  0xdb   :  { %425 = vsyncpa [#allocation4], 1 }

</bundles_post_ra>
